<compile_context>
chip_gen: v7x
topology: tpu7x:2x2x1
jax: 0.10.0
libtpu: 0.0.40
codegen_flags: <defaults>
</compile_context>

<pallas_src>
import functools

import jax
import jax.numpy as jnp
from jax.experimental import pallas as pl
from jax.experimental.pallas import tpu as pltpu


def _simam_kernel(x_ref, o_ref, *, lambda_, hw):
    # Block shape: (TR, H*W). Each row is one (n, c) spatial slab.
    x = x_ref[...].astype(jnp.float32)

    inv_hw = 1.0 / hw
    # PyTorch divides by (H*W - 1); for H*W == 1 it yields 0/0 = NaN.  Avoid a
    # Python ZeroDivisionError at trace time and let 0 * inf produce NaN too.
    inv_n = (1.0 / (hw - 1)) if hw > 1 else float("inf")

    # Fused single pass for both statistics (independent lane-axis reductions).
    s = jnp.sum(x, axis=-1, keepdims=True)        # (TR, 1)  sum(x)
    ss = jnp.sum(x * x, axis=-1, keepdims=True)   # (TR, 1)  sum(x^2)

    mean = s * inv_hw
    # One-pass variance; clamp at 0 to guard against f32 cancellation when
    # |mean| >> std (reference sums (x-mean)^2, which is non-negative).
    v = jnp.maximum((ss - s * mean) * inv_n, 0.0)

    # Per-row reciprocal of 4*(v + lambda); (TR, 1) only, so exact is cheap.
    inv_denom = pl.reciprocal(4.0 * (v + lambda_), approx=False)

    d = x - mean
    e_inv = (d * d) * inv_denom + 0.5             # >= 0.5, so exp(-e_inv) <= 0.61

    # EUP-friendly sigmoid: exp and the approximate reciprocal both land on the
    # EUP slot, keeping the VALU slot free (kernel stays HBM-bound on v7x).
    sig = pl.reciprocal(1.0 + jnp.exp(-e_inv), approx=True)
    o_ref[...] = (x * sig).astype(o_ref.dtype)


def _round_up(a, m):
    return -(-a // m) * m


def _pick_row_tile(rows, cols, itemsize, *, target_bytes=4 << 20,
                   budget_bytes=24 << 20):
    """Rows per block.

    Sized against the *padded* VMEM footprint (lanes rounded to 128, rows to
    the dtype's sublane multiple) and against total resident VMEM of
    4 x tile (double-buffered input + double-buffered output).  The grid is
    shaped into an even number of near-equal steps so v7x's two TensorCores
    get balanced work.
    """
    sublane = max(8, 32 // itemsize)          # 8 for f32, 16 for bf16
    padded_cols = _round_up(cols, 128)        # lane padding actually resident
    bytes_per_row = padded_cols * itemsize

    if rows <= sublane:
        return rows                           # full extent is always legal

    rows_budget = max(sublane,
                      (budget_bytes // (4 * bytes_per_row)) // sublane * sublane)
    rows_target = max(sublane,
                      (target_bytes // bytes_per_row) // sublane * sublane)
    rows_target = min(rows_target, rows_budget)

    n_steps = max(2, _round_up(-(-rows // rows_target), 2))   # even step count
    tr = _round_up(-(-rows // n_steps), sublane)
    return min(tr, _round_up(rows, sublane))


def simam(x, lambda_=0.0001):
    """SimAM forward. x: (N, C, H, W) -> (N, C, H, W), same dtype."""
    N, C, H, W = x.shape
    rows, cols = N * C, H * W
    x2d = x.reshape(rows, cols)

    tr = _pick_row_tile(rows, cols, jnp.dtype(x.dtype).itemsize)
    grid = (pl.cdiv(rows, tr),)

    kernel = functools.partial(_simam_kernel, lambda_=float(lambda_), hw=cols)

    out2d = pl.pallas_call(
        kernel,
        out_shape=jax.ShapeDtypeStruct((rows, cols), x.dtype),
        grid_spec=pltpu.PrefetchScalarGridSpec(
            num_scalar_prefetch=0,
            grid=grid,
            in_specs=[pl.BlockSpec((tr, cols), lambda i: (i, 0))],
            out_specs=pl.BlockSpec((tr, cols), lambda i: (i, 0)),
        ),
        compiler_params=pltpu.CompilerParams(
            dimension_semantics=("parallel",),
            # Explicit scoped-VMEM budget: covers v5e's 16 MiB default while
            # staying well inside v7x's 64 MiB physical VMEM.
            vmem_limit_bytes=32 << 20,
        ),
    )(x2d)

    return out2d.reshape(N, C, H, W)


def _simam_ref(x, lambda_=0.0001):
    """Pure-JAX reference matching the PyTorch forward."""
    x = x.astype(jnp.float32)
    n = x.shape[2] * x.shape[3] - 1
    d = (x - x.mean(axis=(2, 3), keepdims=True)) ** 2
    v = d.sum(axis=(2, 3), keepdims=True) / n
    e_inv = d / (4.0 * (v + lambda_)) + 0.5
    return x * jax.nn.sigmoid(e_inv)


if __name__ == "__main__":
    # Tolerances are loosened slightly vs. a pure-f32 kernel because the
    # sigmoid uses the EUP approximate reciprocal (still O(1e-3) abs error on
    # O(1) outputs; structural bugs would show up as O(0.1-1) errors).

    # Primary test: shapes consistent with the module (N, C, H, W), f32.
    key = jax.random.PRNGKey(0)
    N, C, H, W = 2, 4, 16, 16
    x = jax.random.normal(key, (N, C, H, W), dtype=jnp.float32)

    out = simam(x)
    jax.block_until_ready(out)

    ref = _simam_ref(x)
    assert out.shape == (N, C, H, W)
    assert out.dtype == x.dtype
    assert jnp.max(jnp.abs(out - ref)) < 2e-2

    # Secondary test: multi-step grid with a padded tail block (rows not a
    # multiple of the row tile) and odd spatial dims (H*W not 128-aligned).
    x2 = jax.random.normal(jax.random.PRNGKey(1), (3, 5, 7, 9), dtype=jnp.float32)
    out2 = simam(x2)
    jax.block_until_ready(out2)
    ref2 = _simam_ref(x2)
    assert out2.shape == x2.shape
    assert jnp.max(jnp.abs(out2 - ref2)) < 2e-2

    # Third test: bf16 at the pallas_call boundary (compute stays f32 inside).
    x3 = jax.random.normal(jax.random.PRNGKey(2), (2, 8, 16, 16),
                           dtype=jnp.bfloat16)
    out3 = simam(x3)
    jax.block_until_ready(out3)
    ref3 = _simam_ref(x3.astype(jnp.float32))
    assert out3.shape == x3.shape
    assert out3.dtype == jnp.bfloat16
    assert jnp.max(jnp.abs(out3.astype(jnp.float32) - ref3)) < 5e-2

    print("KERNEL_OK")
</pallas_src>

<mosaic_0001>
module attributes {stable_mosaic.version = 11 : i64} {
  func.func @_simam_kernel(%arg0: i32, %arg1: memref<8x256xf32, #tpu.memory_space<vmem>>, %arg2: memref<8x256xf32, #tpu.memory_space<vmem>>) attributes {dimension_semantics = [#tpu.dimension_semantics<parallel>], iteration_bounds = array<i64: 1>, scalar_prefetch = 0 : i64, scratch_operands = 0 : i64, tpu.core_type = #tpu.core_type<tc>, window_params = [{transform_indices = @transform_0, window_bounds = array<i64: 8, 256>}, {transform_indices = @transform_1, window_bounds = array<i64: 8, 256>}]} {
    %c0 = arith.constant 0 : index
    %c0_0 = arith.constant 0 : index
    %0 = vector.load %arg1[%c0, %c0_0] : memref<8x256xf32, #tpu.memory_space<vmem>>, vector<8x256xf32>
    %cst = arith.constant dense<0.000000e+00> : vector<8xf32>
    %1 = vector.multi_reduction <add>, %0, %cst [1] : vector<8x256xf32> to vector<8xf32>
    %2 = vector.shape_cast %1 : vector<8xf32> to vector<8x1xf32>
    %3 = arith.mulf %0, %0 : vector<8x256xf32>
    %cst_1 = arith.constant dense<0.000000e+00> : vector<8xf32>
    %4 = vector.multi_reduction <add>, %3, %cst_1 [1] : vector<8x256xf32> to vector<8xf32>
    %5 = vector.shape_cast %4 : vector<8xf32> to vector<8x1xf32>
    %cst_2 = arith.constant 3.906250e-03 : f32
    %6 = vector.broadcast %cst_2 : f32 to vector<8x1xf32>
    %7 = arith.mulf %2, %6 : vector<8x1xf32>
    %8 = arith.mulf %2, %7 : vector<8x1xf32>
    %9 = arith.subf %5, %8 : vector<8x1xf32>
    %cst_3 = arith.constant 0.00392156886 : f32
    %10 = vector.broadcast %cst_3 : f32 to vector<8x1xf32>
    %11 = arith.mulf %9, %10 : vector<8x1xf32>
    %cst_4 = arith.constant 0.000000e+00 : f32
    %12 = vector.broadcast %cst_4 : f32 to vector<8x1xf32>
    %13 = arith.maximumf %11, %12 : vector<8x1xf32>
    %cst_5 = arith.constant 9.99999974E-5 : f32
    %14 = vector.broadcast %cst_5 : f32 to vector<8x1xf32>
    %15 = arith.addf %13, %14 : vector<8x1xf32>
    %cst_6 = arith.constant 4.000000e+00 : f32
    %16 = vector.broadcast %cst_6 : f32 to vector<8x1xf32>
    %17 = arith.mulf %16, %15 : vector<8x1xf32>
    %18 = tpu.reciprocal %17 : vector<8x1xf32> -> vector<8x1xf32>
    %19 = vector.broadcast %7 : vector<8x1xf32> to vector<8x256xf32>
    %20 = arith.subf %0, %19 : vector<8x256xf32>
    %21 = arith.mulf %20, %20 : vector<8x256xf32>
    %22 = vector.broadcast %18 : vector<8x1xf32> to vector<8x256xf32>
    %23 = arith.mulf %21, %22 : vector<8x256xf32>
    %cst_7 = arith.constant 5.000000e-01 : f32
    %24 = vector.broadcast %cst_7 : f32 to vector<8x256xf32>
    %25 = arith.addf %23, %24 : vector<8x256xf32>
    %cst_8 = arith.constant 0.000000e+00 : f32
    %26 = vector.broadcast %cst_8 : f32 to vector<8x256xf32>
    %27 = arith.subf %26, %25 : vector<8x256xf32>
    %28 = math.exp %27 : vector<8x256xf32>
    %cst_9 = arith.constant 1.000000e+00 : f32
    %29 = vector.broadcast %cst_9 : f32 to vector<8x256xf32>
    %30 = arith.addf %29, %28 : vector<8x256xf32>
    %31 = tpu.reciprocal %30 {approx = true} : vector<8x256xf32> -> vector<8x256xf32>
    %32 = arith.mulf %0, %31 : vector<8x256xf32>
    %c0_10 = arith.constant 0 : index
    %c0_11 = arith.constant 0 : index
    %33 = vector.load %arg2[%c0_10, %c0_11] : memref<8x256xf32, #tpu.memory_space<vmem>>, vector<8x256xf32>
    tpu.vector_store %arg2[%c0_10, %c0_11], %32 {strides = array<i32>} : memref<8x256xf32, #tpu.memory_space<vmem>>, vector<8x256xf32>,
    return
  }
  func.func @transform_0(%arg0: i32) -> (i32, i32) {
    %c0_i32 = arith.constant 0 : i32
    %c0_i32_0 = arith.constant 0 : i32
    return %arg0, %c0_i32 : i32, i32
  }
  func.func @transform_1(%arg0: i32) -> (i32, i32) {
    %c0_i32 = arith.constant 0 : i32
    %c0_i32_0 = arith.constant 0 : i32
    return %arg0, %c0_i32 : i32, i32
  }
}

</mosaic_0001>

<bundles_post_ra>
// kernel: tpu_custom_call.1
= control target key start
LH: loop header
LB: loop body
LE: loop exit
PB: predicated region body
PF: predicated region fallthrough
CT: control target
= control target key end

     0   :  { %6 = vsyncpa [#allocation3], 0  ;;  %s172_s0 = inlined_call_operand.hbm [shape: f32[8,256], index: 0, kind: input, shape index: {}]   ;;  %s173_s1 = inlined_call_operand.hbm [shape: f32[8,256], index: 1, kind: output, shape index: {}]  }
   0x1   :  { %7 = vsyncpa [#allocation4], 0  ;;  %s136_s6 = smov [#allocation2]   ;;  %s88_s10 = scalar_lea.hbm %s172_s0, 256 }
   0x2   :  { %s14_s7 = sshll.u32 %s136_s6, 4  ;;  %p89_p0 = scmp.ne.s32.totalorder %s172_s0, %s88_s10  ;;  %s15_s7 = int_to_ptr.vmem [resolvable:$true] %s14_s7 }
   0x3   :  { %p92_p1 = scmp.lt.u32.totalorder %s88_s10, %s172_s0 }
   0x5   :  { %p94_p2 = pnand %p92_p1, %p89_p0 }
   0x7   :  { %97 = shalt.err (!%p94_p2)
}
   0x8   :  { %s98_s15 = scalar_lea.vmem %s15_s7, 256  ;;  %p103_p4 = scmp.lt.s32.totalorder %s15_s7, %s15_s7 }
   0x9   :  { %p99_p3 = scmp.ne.s32.totalorder %s15_s7, %s98_s15  ;;  %p104_p5 = scmp.lt.s32.totalorder %s98_s15, %s98_s15 }
   0xb   :  { %p105_p6 = por %p104_p5, %p103_p4 }
   0xd   :  { %p106_p7 = pnand %p105_p6, %p99_p3 }
   0xf   :  { %109 = shalt.err (!%p106_p7)
}
  0x10   :  { %17 = dma.hbm_to_vmem [thread:$0]  %s172_s0, 256, %s15_s7, [#allocation3]  }
  0x11   :  { %132 = dma.done.wait [#allocation3], 256  }
  0x12   :  { %133 = vsyncadd [#allocation3], 4294967040  ;;  %v21_v0 = vld [vmem:[#allocation2] sm:$0xff]  ;;  %v22_v1 = vld [vmem:[#allocation2 + $0x8] sm:$0xff]  ;;  %s137_s0 = smov [#allocation5]  }
  0x13   :  { %v23_v2 = vadd.f32 %v22_v1, %v21_v0  ;;  %v26_v3 = vmul.f32 %v21_v0, %v21_v0  ;;  %v27_v4 = vmul.f32 %v22_v1, %v22_v1  ;;  %s67_s18 = sshll.u32 %s137_s0, 4  ;;  %s68_s18 = int_to_ptr.vmem [resolvable:$true] %s67_s18 }
  0x14   :  { %s110_s19 = scalar_lea.vmem %s68_s18, 256  ;;  %p115_p9 = scmp.lt.s32.totalorder %s68_s18, %s68_s18 }
  0x15   :  { %24 = vadd.xlane.f32.xlu0 %v23_v2  ;;  %v28_v5 = vadd.f32 %v27_v4, %v26_v3  ;;  %p111_p8 = scmp.ne.s32.totalorder %s68_s18, %s110_s19  ;;  %p116_p10 = scmp.lt.s32.totalorder %s110_s19, %s110_s19 }
  0x17   :  { %p117_p11 = por %p116_p10, %p115_p9 }
  0x19   :  { %29 = vadd.xlane.f32.xlu0 %v28_v5  ;;  %p118_p12 = pnand %p117_p11, %p111_p8 }
  0xa2   :  { %v25_v6 = vpop.xlane.xlu0 %24 }
  0xa3   :  { %v31_v7 = vmul.f32 0.00390625, %v25_v6 }
  0xa5   :  { %v32_v8 = vmul.f32 %v31_v7, %v25_v6  ;;  %v39_v15 = vsub.f32 %v21_v0, %v31_v7  ;;  %v40_v16 = vsub.f32 %v22_v1, %v31_v7 }
  0xa6   :  { %v30_v9 = vpop.xlane.xlu0 %29 }
  0xa7   :  { %v33_v10 = vsub.f32 %v30_v9, %v32_v8  ;;  %v41_v17 = vmul.f32 %v39_v15, %v39_v15  ;;  %v42_v18 = vmul.f32 %v40_v16, %v40_v16 }
  0xa9   :  { %v34_v11 = vmul.f32 0.003921569, %v33_v10 }
  0xab   :  { %v35_v12 = vmax.f32 %v34_v11, 0.0 }
  0xad   :  { %v36_v13 = vadd.f32 0.0001, %v35_v12 }
  0xaf   :  { %v37_v14 = vmul.f32 4.0, %v36_v13 }
  0xb1   :  { %78 = vrcp.f32 %v37_v14 }
  0xbb   :  { %v79_v19 = vpop.eup %78 }
  0xbc   :  { %v43_v20 = vmul.f32 %v79_v19, %v41_v17  ;;  %v44_v21 = vmul.f32 %v79_v19, %v42_v18 }
  0xbe   :  { %v45_v22 = vadd.f32 0.5, %v43_v20  ;;  %v46_v23 = vadd.f32 0.5, %v44_v21 }
  0xc0   :  { %v47_v24 = vsub.f32 0.0, %v45_v22  ;;  %v48_v25 = vsub.f32 0.0, %v46_v23 }
  0xc2   :  { %v49_v26 = vmul.f32 1.442695, %v47_v24  ;;  %v51_v27 = vmul.f32 1.442695, %v48_v25 }
  0xc4   :  { %80 = vpow2.f32 %v49_v26 }
  0xc5   :  { %82 = vpow2.f32 %v51_v27 }
  0xce   :  { %v81_v28 = vpop.eup %80 }
  0xcf   :  { %v83_v29 = vpop.eup %82  ;;  %v53_v30 = vadd.f32 1.0, %v81_v28 }
  0xd0   :  { %v54_v31 = vadd.f32 1.0, %v83_v29 }
  0xd1   :  { %84 = vrcp.f32 %v53_v30 }
  0xd2   :  { %86 = vrcp.f32 %v54_v31 }
  0xdb   :  { %v85_v32 = vpop.eup %84 }
  0xdc   :  { %v87_v33 = vpop.eup %86  ;;  %v57_v34 = vmul.f32 %v85_v32, %v21_v0 }
  0xdd   :  { %v58_v35 = vmul.f32 %v87_v33, %v22_v1 }
  0xde   :  { %59 = vst [vmem:[#allocation5] sm:$0xff] %v57_v34 }
  0xdf   :  { %60 = vst [vmem:[#allocation5 + $0x8] sm:$0xff] %v58_v35 }
  0xe0   :  { %121 = shalt.err (!%p118_p12)
}
  0xe1   :  { %s122_s22 = scalar_lea.hbm %s173_s1, 256 }
  0xe2   :  { %p123_p13 = scmp.ne.s32.totalorder %s173_s1, %s122_s22  ;;  %p126_p0 = scmp.lt.u32.totalorder %s122_s22, %s173_s1 }
  0xe4   :  { %p128_p1 = pnand %p126_p0, %p123_p13 }
  0xe6   :  { %131 = shalt.err (!%p128_p1)
}
  0xe7   :  { %70 = dma.vmem_to_hbm [thread:$0]  %s68_s18, 256, %s173_s1, [#allocation4]  }
  0xe8   :  { %134 = dma.done.wait [#allocation4], 256  }
  0xe9   :  { %135 = vsyncadd [#allocation4], 4294967040 }
  0xea   :  { %74 = vsyncpa [#allocation3], 1 }
  0xeb   :  { %75 = vsyncpa [#allocation4], 1 }

</bundles_post_ra>
